<compile_context>
chip_gen: v6e
topology: v6e:2x2x1
jax: 0.10.0
libtpu: 0.0.40
codegen_flags: <defaults>
</compile_context>

<pallas_src>
import jax
import jax.numpy as jnp
from jax.experimental import pallas as pl
from jax.experimental.pallas import tpu as pltpu


def spatial_input_kernel(x_ref, w_ref, o_ref):
    x = x_ref[...]   # (bm, 9)      fp32 spatial tile
    w = w_ref[...]   # (16, tn)     fp32 packed weights + biases (lane slice)

    # VPU outer-product FMAs: (bm,1) * (1,tn) broadcasts, biases folded in.
    loc = x[:, 0:1] * w[0:1, :] + x[:, 1:2] * w[1:2, :] + w[9:10, :]
    vel = x[:, 2:3] * w[2:3, :] + x[:, 3:4] * w[3:4, :] + w[10:11, :]
    ang = x[:, 4:5] * w[4:5, :] + x[:, 5:6] * w[5:6, :] + w[11:12, :]
    nrm = x[:, 6:7] * w[6:7, :] + x[:, 7:8] * w[7:8, :] + x[:, 8:9] * w[8:9, :]

    o_ref[...] = (loc * vel * ang * nrm).astype(o_ref.dtype)


def spatial_input(spatial, params, *, bm=512, tn=1024, out_dtype=jnp.float32):
    """spatial: [B, 9] float32.  params: dict of weights/biases.  Returns [B, size]."""
    B, F = spatial.shape
    assert F == 9
    size = params["wl"].shape[1]

    # Lane-dense output: pad out_features up to a multiple of 128.
    size_p = ((size + 127) // 128) * 128
    tn_eff = int(min(tn, size_p))
    tn_eff = ((tn_eff + 127) // 128) * 128
    n_ftiles = pl.cdiv(size_p, tn_eff)
    size_pp = n_ftiles * tn_eff  # padded so size_pp % tn_eff == 0

    # Pack all weights/biases into a single (16, size_pp) operand.
    w = jnp.zeros((16, size_pp), jnp.float32)
    w = w.at[0:2, :size].set(params["wl"].astype(jnp.float32))
    w = w.at[2:4, :size].set(params["wv"].astype(jnp.float32))
    w = w.at[4:6, :size].set(params["wa"].astype(jnp.float32))
    w = w.at[6:9, :size].set(params["wn"].astype(jnp.float32))
    w = w.at[9, :size].set(params["bl"].reshape(size).astype(jnp.float32))
    w = w.at[10, :size].set(params["bv"].reshape(size).astype(jnp.float32))
    w = w.at[11, :size].set(params["ba"].reshape(size).astype(jnp.float32))

    # Batch tiling: clamp tile for small B, pad batch up to a tile multiple.
    bm_eff = int(min(bm, ((B + 7) // 8) * 8))
    n_btiles = pl.cdiv(B, bm_eff)
    B_pad = n_btiles * bm_eff
    x = spatial.astype(jnp.float32)
    if B_pad != B:
        x = jnp.pad(x, ((0, B_pad - B), (0, 0)))

    out_bytes = jnp.dtype(out_dtype).itemsize
    cost = pl.CostEstimate(
        flops=17 * B_pad * size_pp,
        transcendentals=0,
        bytes_accessed=(B_pad * 9 * 4
                        + 16 * size_pp * 4 * n_btiles
                        + B_pad * size_pp * out_bytes),
    )

    out = pl.pallas_call(
        spatial_input_kernel,
        out_shape=jax.ShapeDtypeStruct((B_pad, size_pp), out_dtype),
        grid_spec=pltpu.PrefetchScalarGridSpec(
            num_scalar_prefetch=0,
            grid=(n_btiles, n_ftiles),
            in_specs=[
                pl.BlockSpec((bm_eff, 9), lambda i, j: (i, 0)),      # spatial tile
                pl.BlockSpec((16, tn_eff), lambda i, j: (0, j)),     # packed W + b
            ],
            out_specs=pl.BlockSpec((bm_eff, tn_eff), lambda i, j: (i, j)),
        ),
        compiler_params=pltpu.CompilerParams(
            dimension_semantics=("parallel", "parallel")),
        cost_estimate=cost,
    )(x, w)

    return out[:B, :size]


def init_params(key, size):
    """Deterministic synthetic parameters matching nn.Linear shapes (transposed)."""
    ks = jax.random.split(key, 7)
    scale = 0.1
    return {
        "wl": scale * jax.random.normal(ks[0], (2, size), jnp.float32),
        "bl": scale * jax.random.normal(ks[1], (1, size), jnp.float32),
        "wv": scale * jax.random.normal(ks[2], (2, size), jnp.float32),
        "bv": scale * jax.random.normal(ks[3], (1, size), jnp.float32),
        "wa": scale * jax.random.normal(ks[4], (2, size), jnp.float32),
        "ba": scale * jax.random.normal(ks[5], (1, size), jnp.float32),
        "wn": scale * jax.random.normal(ks[6], (3, size), jnp.float32),
    }


def spatial_input_ref(spatial, params):
    """Pure-JAX reference mirroring the PyTorch forward."""
    loc = spatial[:, 0:2] @ params["wl"] + params["bl"]
    vel = spatial[:, 2:4] @ params["wv"] + params["bv"]
    ang = spatial[:, 4:6] @ params["wa"] + params["ba"]
    nrm = spatial[:, 6:9] @ params["wn"]
    return loc * vel * ang * nrm


if __name__ == "__main__":
    key = jax.random.PRNGKey(0)
    k_x, k_p = jax.random.split(key)

    # Small shapes consistent with the module: batch=16, size=128.
    B, size = 16, 128
    spatial = jax.random.normal(k_x, (B, 9), jnp.float32)
    params = init_params(k_p, size)

    out = spatial_input(spatial, params)
    out = jax.block_until_ready(out)

    ref = spatial_input_ref(spatial, params)
    assert out.shape == (B, size)
    assert jnp.allclose(out, ref, atol=1e-5, rtol=1e-5), "mismatch vs reference"

    # Exercise the padded-batch / multi-tile path (B not a multiple of bm,
    # size not a multiple of the lane width).
    B2, size2 = 1000, 200
    spatial2 = jax.random.normal(k_x, (B2, 9), jnp.float32)
    params2 = init_params(k_p, size2)
    out2 = jax.block_until_ready(spatial_input(spatial2, params2, bm=512))
    ref2 = spatial_input_ref(spatial2, params2)
    assert out2.shape == (B2, size2)
    assert jnp.allclose(out2, ref2, atol=1e-5, rtol=1e-5), "mismatch (padded batch)"

    print("KERNEL_OK")
</pallas_src>

<mosaic_0001>
module attributes {stable_mosaic.version = 11 : i64} {
  func.func @spatial_input_kernel(%arg0: i32, %arg1: i32, %arg2: memref<16x9xf32, #tpu.memory_space<vmem>>, %arg3: memref<16x128xf32, #tpu.memory_space<vmem>>, %arg4: memref<16x128xf32, #tpu.memory_space<vmem>>) attributes {dimension_semantics = [#tpu.dimension_semantics<parallel>, #tpu.dimension_semantics<parallel>], iteration_bounds = array<i64: 1, 1>, scalar_prefetch = 0 : i64, scratch_operands = 0 : i64, tpu.core_type = #tpu.core_type<tc>, window_params = [{transform_indices = @transform_0, window_bounds = array<i64: 16, 9>}, {transform_indices = @transform_1, window_bounds = array<i64: 16, 128>}, {transform_indices = @transform_2, window_bounds = array<i64: 16, 128>}]} {
    %c0 = arith.constant 0 : index
    %c0_0 = arith.constant 0 : index
    %0 = vector.load %arg2[%c0, %c0_0] : memref<16x9xf32, #tpu.memory_space<vmem>>, vector<16x9xf32>
    %c0_1 = arith.constant 0 : index
    %c0_2 = arith.constant 0 : index
    %1 = vector.load %arg3[%c0_1, %c0_2] : memref<16x128xf32, #tpu.memory_space<vmem>>, vector<16x128xf32>
    %2 = vector.extract_strided_slice %0 {offsets = [0, 0], sizes = [16, 1], strides = [1, 1]} : vector<16x9xf32> to vector<16x1xf32>
    %3 = vector.extract_strided_slice %1 {offsets = [0, 0], sizes = [1, 128], strides = [1, 1]} : vector<16x128xf32> to vector<1x128xf32>
    %4 = vector.broadcast %2 : vector<16x1xf32> to vector<16x128xf32>
    %5 = vector.broadcast %3 : vector<1x128xf32> to vector<16x128xf32>
    %6 = arith.mulf %4, %5 : vector<16x128xf32>
    %7 = vector.extract_strided_slice %0 {offsets = [0, 1], sizes = [16, 1], strides = [1, 1]} : vector<16x9xf32> to vector<16x1xf32>
    %8 = vector.extract_strided_slice %1 {offsets = [1, 0], sizes = [1, 128], strides = [1, 1]} : vector<16x128xf32> to vector<1x128xf32>
    %9 = vector.broadcast %7 : vector<16x1xf32> to vector<16x128xf32>
    %10 = vector.broadcast %8 : vector<1x128xf32> to vector<16x128xf32>
    %11 = arith.mulf %9, %10 : vector<16x128xf32>
    %12 = arith.addf %6, %11 : vector<16x128xf32>
    %13 = vector.extract_strided_slice %1 {offsets = [9, 0], sizes = [1, 128], strides = [1, 1]} : vector<16x128xf32> to vector<1x128xf32>
    %14 = vector.broadcast %13 : vector<1x128xf32> to vector<16x128xf32>
    %15 = arith.addf %12, %14 : vector<16x128xf32>
    %16 = vector.extract_strided_slice %0 {offsets = [0, 2], sizes = [16, 1], strides = [1, 1]} : vector<16x9xf32> to vector<16x1xf32>
    %17 = vector.extract_strided_slice %1 {offsets = [2, 0], sizes = [1, 128], strides = [1, 1]} : vector<16x128xf32> to vector<1x128xf32>
    %18 = vector.broadcast %16 : vector<16x1xf32> to vector<16x128xf32>
    %19 = vector.broadcast %17 : vector<1x128xf32> to vector<16x128xf32>
    %20 = arith.mulf %18, %19 : vector<16x128xf32>
    %21 = vector.extract_strided_slice %0 {offsets = [0, 3], sizes = [16, 1], strides = [1, 1]} : vector<16x9xf32> to vector<16x1xf32>
    %22 = vector.extract_strided_slice %1 {offsets = [3, 0], sizes = [1, 128], strides = [1, 1]} : vector<16x128xf32> to vector<1x128xf32>
    %23 = vector.broadcast %21 : vector<16x1xf32> to vector<16x128xf32>
    %24 = vector.broadcast %22 : vector<1x128xf32> to vector<16x128xf32>
    %25 = arith.mulf %23, %24 : vector<16x128xf32>
    %26 = arith.addf %20, %25 : vector<16x128xf32>
    %27 = vector.extract_strided_slice %1 {offsets = [10, 0], sizes = [1, 128], strides = [1, 1]} : vector<16x128xf32> to vector<1x128xf32>
    %28 = vector.broadcast %27 : vector<1x128xf32> to vector<16x128xf32>
    %29 = arith.addf %26, %28 : vector<16x128xf32>
    %30 = vector.extract_strided_slice %0 {offsets = [0, 4], sizes = [16, 1], strides = [1, 1]} : vector<16x9xf32> to vector<16x1xf32>
    %31 = vector.extract_strided_slice %1 {offsets = [4, 0], sizes = [1, 128], strides = [1, 1]} : vector<16x128xf32> to vector<1x128xf32>
    %32 = vector.broadcast %30 : vector<16x1xf32> to vector<16x128xf32>
    %33 = vector.broadcast %31 : vector<1x128xf32> to vector<16x128xf32>
    %34 = arith.mulf %32, %33 : vector<16x128xf32>
    %35 = vector.extract_strided_slice %0 {offsets = [0, 5], sizes = [16, 1], strides = [1, 1]} : vector<16x9xf32> to vector<16x1xf32>
    %36 = vector.extract_strided_slice %1 {offsets = [5, 0], sizes = [1, 128], strides = [1, 1]} : vector<16x128xf32> to vector<1x128xf32>
    %37 = vector.broadcast %35 : vector<16x1xf32> to vector<16x128xf32>
    %38 = vector.broadcast %36 : vector<1x128xf32> to vector<16x128xf32>
    %39 = arith.mulf %37, %38 : vector<16x128xf32>
    %40 = arith.addf %34, %39 : vector<16x128xf32>
    %41 = vector.extract_strided_slice %1 {offsets = [11, 0], sizes = [1, 128], strides = [1, 1]} : vector<16x128xf32> to vector<1x128xf32>
    %42 = vector.broadcast %41 : vector<1x128xf32> to vector<16x128xf32>
    %43 = arith.addf %40, %42 : vector<16x128xf32>
    %44 = vector.extract_strided_slice %0 {offsets = [0, 6], sizes = [16, 1], strides = [1, 1]} : vector<16x9xf32> to vector<16x1xf32>
    %45 = vector.extract_strided_slice %1 {offsets = [6, 0], sizes = [1, 128], strides = [1, 1]} : vector<16x128xf32> to vector<1x128xf32>
    %46 = vector.broadcast %44 : vector<16x1xf32> to vector<16x128xf32>
    %47 = vector.broadcast %45 : vector<1x128xf32> to vector<16x128xf32>
    %48 = arith.mulf %46, %47 : vector<16x128xf32>
    %49 = vector.extract_strided_slice %0 {offsets = [0, 7], sizes = [16, 1], strides = [1, 1]} : vector<16x9xf32> to vector<16x1xf32>
    %50 = vector.extract_strided_slice %1 {offsets = [7, 0], sizes = [1, 128], strides = [1, 1]} : vector<16x128xf32> to vector<1x128xf32>
    %51 = vector.broadcast %49 : vector<16x1xf32> to vector<16x128xf32>
    %52 = vector.broadcast %50 : vector<1x128xf32> to vector<16x128xf32>
    %53 = arith.mulf %51, %52 : vector<16x128xf32>
    %54 = arith.addf %48, %53 : vector<16x128xf32>
    %55 = vector.extract_strided_slice %0 {offsets = [0, 8], sizes = [16, 1], strides = [1, 1]} : vector<16x9xf32> to vector<16x1xf32>
    %56 = vector.extract_strided_slice %1 {offsets = [8, 0], sizes = [1, 128], strides = [1, 1]} : vector<16x128xf32> to vector<1x128xf32>
    %57 = vector.broadcast %55 : vector<16x1xf32> to vector<16x128xf32>
    %58 = vector.broadcast %56 : vector<1x128xf32> to vector<16x128xf32>
    %59 = arith.mulf %57, %58 : vector<16x128xf32>
    %60 = arith.addf %54, %59 : vector<16x128xf32>
    %61 = arith.mulf %15, %29 : vector<16x128xf32>
    %62 = arith.mulf %61, %43 : vector<16x128xf32>
    %63 = arith.mulf %62, %60 : vector<16x128xf32>
    %c0_3 = arith.constant 0 : index
    %c0_4 = arith.constant 0 : index
    %64 = vector.load %arg4[%c0_3, %c0_4] : memref<16x128xf32, #tpu.memory_space<vmem>>, vector<16x128xf32>
    tpu.vector_store %arg4[%c0_3, %c0_4], %63 {strides = array<i32>} : memref<16x128xf32, #tpu.memory_space<vmem>>, vector<16x128xf32>,
    return
  }
  func.func @transform_0(%arg0: i32, %arg1: i32) -> (i32, i32) {
    %c0_i32 = arith.constant 0 : i32
    %c0_i32_0 = arith.constant 0 : i32
    return %arg0, %c0_i32 : i32, i32
  }
  func.func @transform_1(%arg0: i32, %arg1: i32) -> (i32, i32) {
    %c0_i32 = arith.constant 0 : i32
    %c0_i32_0 = arith.constant 0 : i32
    return %c0_i32, %arg1 : i32, i32
  }
  func.func @transform_2(%arg0: i32, %arg1: i32) -> (i32, i32) {
    %c0_i32 = arith.constant 0 : i32
    return %arg0, %arg1 : i32, i32
  }
}

</mosaic_0001>

<bundles_post_ra>
// kernel: tpu_custom_call.1
= control target key start
LH: loop header
LB: loop body
LE: loop exit
PB: predicated region body
PF: predicated region fallthrough
CT: control target
= control target key end

     0   :  { %7 = vsyncpa [#allocation3], 0  ;;  %s367_s0 = inlined_call_operand.hbm [shape: f32[16,9], index: 0, kind: input, shape index: {}]   ;;  %s368_s1 = inlined_call_operand.hbm [shape: f32[16,128], index: 1, kind: input, shape index: {}]   ;;  %s369_s2 = inlined_call_operand.hbm [shape: f32[16,128], index: 2, kind: output, shape index: {}]  }
   0x1   :  { %8 = vsyncpa [#allocation6], 0 }
   0x2   :  { %9 = vsyncpa [#allocation4], 0  ;;  %s320_s9 = smov [#allocation2]  }
   0x3   :  { %s15_s10 = sshll.u32 %s320_s9, 4  ;;  %s16_s10 = int_to_ptr.vmem [resolvable:$true] %s15_s10 }
   0x4   :  { %s262_s11 = scalar_lea.vmem %s16_s10, 256  ;;  %p267_p1 = scmp.lt.s32.totalorder %s16_s10, %s16_s10 }
   0x5   :  { %p263_p0 = scmp.ne.s32.totalorder %s16_s10, %s262_s11  ;;  %p268_p2 = scmp.lt.s32.totalorder %s262_s11, %s262_s11 }
   0x7   :  { %p269_p3 = por %p268_p2, %p267_p1 }
   0x9   :  { %p270_p4 = pnand %p269_p3, %p263_p0 }
   0xb   :  { %273 = shalt.err (!%p270_p4)
}
   0xc   :  { %s321_s12 = smov 128   ;;  %s322_s13 = smov 8  }
   0xd   :  { %21 = dma.hbm_to_vmem [thread:$0]  %s367_s0, 256, %s16_s10, [#allocation3], %s321_s12, %s321_s12, %s322_s13  }
   0xe   :  { %s323_s16 = smov [#allocation5]  }
   0xf   :  { %s27_s17 = sshll.u32 %s323_s16, 4  ;;  %s28_s17 = int_to_ptr.vmem [resolvable:$true] %s27_s17 }
  0x10   :  { %s282_s18 = scalar_lea.vmem %s28_s17, 256  ;;  %p287_p6 = scmp.lt.s32.totalorder %s28_s17, %s28_s17 }
  0x11   :  { %p283_p5 = scmp.ne.s32.totalorder %s28_s17, %s282_s18  ;;  %p288_p7 = scmp.lt.s32.totalorder %s282_s18, %s282_s18 }
  0x13   :  { %p289_p8 = por %p288_p7, %p287_p6 }
  0x15   :  { %p290_p9 = pnand %p289_p8, %p283_p5 }
  0x17   :  { %293 = shalt.err (!%p290_p9)
}
  0x18   :  { %33 = dma.hbm_to_vmem [thread:$0]  %s368_s1, 256, %s28_s17, [#allocation6], %s321_s12, %s321_s12, %s322_s13  }
  0x19   :  { %314 = dma.done.wait [#allocation3], 256  }
  0x1a   :  { %315 = vsyncadd [#allocation3], 4294967040 }
  0x1b   :  { %316 = dma.done.wait [#allocation6], 256  }
  0x1c   :  { %317 = vsyncadd [#allocation6], 4294967040  ;;  %v324_v0 = vmov 1   ;;  %v325_v1 = vmov 0   ;;  %v40_v2 = vld [vmem:[#allocation2] sm:$0xff]  ;;  %v41_v3 = vld [vmem:[#allocation2 + $0x8] sm:$0xff]  ;;  %v54_v16 = vlaneseq }
  0x1d   :  { %241 = vset.pattern.permute.xlu1 %v324_v0  ;;  %240 = vset.pattern.permute.xlu0 %v325_v1  ;;  %v326_v4 = vmov 2   ;;  %v327_v5 = vmov 3   ;;  %v328_v6 = vmov 4   ;;  %v329_v7 = vmov 5   ;;  %v42_v25 = vld [vmem:[#allocation5] sm:$0xff]  ;;  %v43_v42 = vld [vmem:[#allocation5 + $0x8] sm:$0xff] }
  0x1e   :  { %61 = vperm.xlu1 %241, %v40_v2   ;;  %46 = vperm.xlu0 %240, %v40_v2   ;;  %v330_v8 = vmov 6   ;;  %v331_v9 = vmov 8   ;;  %v332_v10 = vmov 7   ;;  %v55_v19 = vshrl.u32 %v54_v16, 7  ;;  %s333_s0 = smov [#allocation7]  }
  0x1f   :  { %s213_s1 = sshll.u32 %s333_s0, 4  ;;  %s214_s1 = int_to_ptr.vmem [resolvable:$true] %s213_s1 }
  0x20   :  { %v70_v22 = vsub.s32 1, %v55_v19  ;;  %v56_v23 = vsub.s32 0, %v55_v19  ;;  %v106_v24 = vsub.s32 3, %v55_v19  ;;  %v92_v26 = vsub.s32 2, %v55_v19  ;;  %s294_s21 = scalar_lea.vmem %s214_s1, 256  ;;  %p299_p11 = scmp.lt.s32.totalorder %s214_s1, %s214_s1 }
  0x21   :  { %v128_v27 = vsub.s32 4, %v55_v19  ;;  %v142_v28 = vsub.s32 5, %v55_v19  ;;  %v164_v46 = vsub.s32 6, %v55_v19  ;;  %v178_v47 = vsub.s32 7, %v55_v19  ;;  %p295_p10 = scmp.ne.s32.totalorder %s214_s1, %s294_s21  ;;  %p300_p12 = scmp.lt.s32.totalorder %s294_s21, %s294_s21 }
  0x22   :  { %65 = vperm.xlu1 %241, %v41_v3   ;;  %51 = vperm.xlu0 %240, %v41_v3   ;;  %v71_v30 = vrot.slane %v42_v25, %v70_v22  ;;  %v57_v31 = vrot.slane %v42_v25, %v56_v23  ;;  %v107_v32 = vrot.slane %v42_v25, %v106_v24 }
  0x23   :  { %v93_v34 = vrot.slane %v42_v25, %v92_v26  ;;  %v129_v35 = vrot.slane %v42_v25, %v128_v27  ;;  %v143_v36 = vrot.slane %v42_v25, %v142_v28  ;;  %v79_v48 = vrot.slane %v43_v42, %v70_v22  ;;  %p301_p13 = por %p300_p12, %p299_p11 }
  0x24   :  { %v115_v50 = vrot.slane %v43_v42, %v92_v26  ;;  %v151_v53 = vrot.slane %v43_v42, %v106_v24  ;;  %v165_v55 = vrot.slane %v42_v25, %v164_v46  ;;  %v179_v56 = vrot.slane %v42_v25, %v178_v47 }
  0x25   :  { %v195_v57 = vrot.slane %v43_v42, %v56_v23  ;;  %p302_p0 = pnand %p301_p13, %p295_p10 }
  0x26   :  { %243 = vset.pattern.permute.xlu1 %v326_v4  ;;  %242 = vset.pattern.permute.xlu0 %v326_v4 }
  0x27   :  { %87 = vperm.xlu1 %243, %v41_v3   ;;  %83 = vperm.xlu0 %242, %v40_v2  }
  0x2b   :  { %244 = vset.pattern.permute.xlu1 %v327_v5  ;;  %245 = vset.pattern.permute.xlu0 %v327_v5 }
  0x2c   :  { %97 = vperm.xlu1 %244, %v40_v2   ;;  %101 = vperm.xlu0 %245, %v41_v3  }
  0x30   :  { %246 = vset.pattern.permute.xlu1 %v328_v6  ;;  %247 = vset.pattern.permute.xlu0 %v329_v7 }
  0x31   :  { %119 = vperm.xlu1 %246, %v40_v2   ;;  %133 = vperm.xlu0 %247, %v40_v2  }
  0x35   :  { %123 = vperm.xlu1 %246, %v41_v3   ;;  %250 = vset.pattern.permute.xlu0 %v330_v8 }
  0x36   :  { %159 = vperm.xlu0 %250, %v41_v3  }
  0x39   :  { %248 = vset.pattern.permute.xlu1 %v329_v7 }
  0x3a   :  { %137 = vperm.xlu1 %248, %v41_v3   ;;  %252 = vset.pattern.permute.xlu0 %v331_v9 }
  0x3b   :  { %185 = vperm.xlu0 %252, %v40_v2  }
  0x3e   :  { %249 = vset.pattern.permute.xlu1 %v330_v8 }
  0x3f   :  { %155 = vperm.xlu1 %249, %v40_v2  }
  0x43   :  { %251 = vset.pattern.permute.xlu1 %v332_v10 }
  0x44   :  { %169 = vperm.xlu1 %251, %v40_v2  }
  0x48   :  { %173 = vperm.xlu1 %251, %v41_v3  }
  0x4c   :  { %253 = vset.pattern.permute.xlu1 %v331_v9 }
  0x4d   :  { %189 = vperm.xlu1 %253, %v41_v3  }
  0x99   :  { %v62_v11 = vpop.permute.xlu1 %61  ;;  %v47_v12 = vpop.permute.xlu0 %46 }
  0x9a   :  { %v72_v38 = vmul.f32 %v71_v30, %v62_v11  ;;  %v58_v39 = vmul.f32 %v57_v31, %v47_v12 }
  0x9c   :  { %v74_v49 = vadd.f32 %v72_v38, %v58_v39 }
  0x9d   :  { %v66_v13 = vpop.permute.xlu1 %65  ;;  %v52_v15 = vpop.permute.xlu0 %51 }
  0x9e   :  { %v80_v60 = vadd.f32 %v79_v48, %v74_v49  ;;  %v73_v62 = vmul.f32 %v71_v30, %v66_v13  ;;  %v59_v63 = vmul.f32 %v57_v31, %v52_v15 }
  0xa0   :  { %v75_v11 = vadd.f32 %v73_v62, %v59_v63 }
  0xa2   :  { %v88_v14 = vpop.permute.xlu1 %87  ;;  %v84_v17 = vpop.permute.xlu0 %83 }
  0xa3   :  { %v94_v40 = vmul.f32 %v93_v34, %v84_v17  ;;  %v95_v0 = vmul.f32 %v93_v34, %v88_v14  ;;  %v81_v14 = vadd.f32 %v79_v48, %v75_v11 }
  0xa7   :  { %v98_v18 = vpop.permute.xlu1 %97  ;;  %v102_v21 = vpop.permute.xlu0 %101 }
  0xa8   :  { %v108_v41 = vmul.f32 %v107_v32, %v98_v18  ;;  %v109_v58 = vmul.f32 %v107_v32, %v102_v21 }
  0xaa   :  { %v110_v51 = vadd.f32 %v108_v41, %v94_v40  ;;  %v111_v7 = vadd.f32 %v109_v58, %v95_v0 }
  0xac   :  { %v120_v20 = vpop.permute.xlu1 %119  ;;  %v134_v33 = vpop.permute.xlu0 %133  ;;  %v116_v61 = vadd.f32 %v115_v50, %v110_v51  ;;  %v117_v19 = vadd.f32 %v115_v50, %v111_v7 }
  0xad   :  { %v130_v44 = vmul.f32 %v129_v35, %v120_v20  ;;  %v144_v45 = vmul.f32 %v143_v36, %v134_v33 }
  0xae   :  { %v200_v9 = vmul.f32 %v116_v61, %v80_v60  ;;  %v201_v23 = vmul.f32 %v117_v19, %v81_v14 }
  0xaf   :  { %v146_v54 = vadd.f32 %v144_v45, %v130_v44 }
  0xb0   :  { %v124_v29 = vpop.permute.xlu1 %123 }
  0xb1   :  { %v160_v43 = vpop.permute.xlu0 %159  ;;  %v152_v3 = vadd.f32 %v151_v53, %v146_v54  ;;  %v131_v8 = vmul.f32 %v129_v35, %v124_v29 }
  0xb2   :  { %v167_v20 = vmul.f32 %v165_v55, %v160_v43 }
  0xb3   :  { %v202_v17 = vmul.f32 %v200_v9, %v152_v3 }
  0xb5   :  { %v138_v37 = vpop.permute.xlu1 %137 }
  0xb6   :  { %v186_v59 = vpop.permute.xlu0 %185  ;;  %v145_v1 = vmul.f32 %v143_v36, %v138_v37 }
  0xb7   :  { %v196_v6 = vmul.f32 %v195_v57, %v186_v59 }
  0xb8   :  { %v147_v12 = vadd.f32 %v145_v1, %v131_v8 }
  0xba   :  { %v156_v52 = vpop.permute.xlu1 %155  ;;  %v153_v21 = vadd.f32 %v151_v53, %v147_v12 }
  0xbb   :  { %v166_v4 = vmul.f32 %v165_v55, %v156_v52 }
  0xbc   :  { %v203_v27 = vmul.f32 %v201_v23, %v153_v21 }
  0xbf   :  { %v170_v2 = vpop.permute.xlu1 %169 }
  0xc0   :  { %v180_v5 = vmul.f32 %v179_v56, %v170_v2 }
  0xc2   :  { %v182_v10 = vadd.f32 %v180_v5, %v166_v4 }
  0xc3   :  { %v174_v16 = vpop.permute.xlu1 %173 }
  0xc4   :  { %v198_v18 = vadd.f32 %v196_v6, %v182_v10  ;;  %v181_v13 = vmul.f32 %v179_v56, %v174_v16 }
  0xc6   :  { %v204_v15 = vmul.f32 %v202_v17, %v198_v18  ;;  %v183_v24 = vadd.f32 %v181_v13, %v167_v20 }
  0xc8   :  { %206 = vst [vmem:[#allocation7] sm:$0xff] %v204_v15  ;;  %v190_v22 = vpop.permute.xlu1 %189 }
  0xc9   :  { %v197_v25 = vmul.f32 %v195_v57, %v190_v22 }
  0xcb   :  { %v199_v26 = vadd.f32 %v197_v25, %v183_v24 }
  0xcd   :  { %v205_v28 = vmul.f32 %v203_v27, %v199_v26 }
  0xcf   :  { %207 = vst [vmem:[#allocation7 + $0x8] sm:$0xff] %v205_v28 }
  0xd0   :  { %305 = shalt.err (!%p302_p0)
}
  0xd1   :  { %219 = dma.vmem_to_hbm [thread:$0]  %s214_s1, 256, %s369_s2, [#allocation4], %s321_s12, %s321_s12, %s322_s13  }
  0xd2   :  { %318 = dma.done.wait [#allocation4], 256  }
  0xd3   :  { %319 = vsyncadd [#allocation4], 4294967040 }
  0xd4   :  { %223 = vsyncpa [#allocation3], 1 }
  0xd5   :  { %224 = vsyncpa [#allocation6], 1 }
  0xd6   :  { %225 = vsyncpa [#allocation4], 1 }

</bundles_post_ra>
